<compile_context>
chip_gen: v7x
topology: tpu7x:2x2x1
jax: 0.10.0
libtpu: 0.0.40
codegen_flags: <defaults>
</compile_context>

<pallas_src>
import math
import numpy as np
import jax
import jax.numpy as jnp
from jax.experimental import pallas as pl
from jax.experimental.pallas import tpu as pltpu

# ---- small, module-consistent sizes ----
B  = 16    # batch
D  = 32    # input_dim
H  = 32    # MLP hidden width
Z  = 16    # d_z (latent dim)
K  = 8     # n_comps (pseudo-inputs / mixture components)
BETA = 1.0
LOG2PI = math.log(2.0 * math.pi)


def vamp_vae_kernel(x_ref, epsx_ref,
                    w1e_ref, b1e_ref, w2e_ref, b2e_ref,
                    w1d_ref, b1d_ref, w2d_ref, b2d_ref,
                    mu_u_ref, ivar_ref, c1_ref,
                    out_ref):
    """One batch tile: encoder -> rsample -> decoder -> per-row ELBO terms -> scalar sum."""
    i = pl.program_id(0)

    @pl.when(i == 0)
    def _():
        out_ref[...] = jnp.zeros_like(out_ref)

    x = x_ref[...]            # (TB, D)
    eps_x = epsx_ref[...]     # (TB, Z)

    # --- encoder on x only (encoder(u) is hoisted to the wrapper) ---
    h1 = jnp.maximum(
        jnp.dot(x, w1e_ref[...], preferred_element_type=jnp.float32) + b1e_ref[...], 0.0)
    enc = jnp.dot(h1, w2e_ref[...], preferred_element_type=jnp.float32) + b2e_ref[...]  # (TB, 2Z)
    mu = enc[:, :Z]
    var_q = jax.nn.softplus(enc[:, Z:]) + 1e-8
    std_q = jnp.sqrt(var_q)
    z = mu + eps_x * std_q                                                    # (TB, Z)

    # --- log q(z|x): (z-mu)/std == eps, -log std == -0.5*log(var) ---
    log_q = (-0.5 * jnp.sum(jnp.log(var_q), axis=-1, keepdims=True)
             - 0.5 * Z * LOG2PI
             - 0.5 * jnp.sum(eps_x * eps_x, axis=-1, keepdims=True))          # (TB, 1)

    # --- decoder + unit-variance Gaussian reconstruction ---
    hd = jnp.maximum(
        jnp.dot(z, w1d_ref[...], preferred_element_type=jnp.float32) + b1d_ref[...], 0.0)
    xhat = jnp.dot(hd, w2d_ref[...], preferred_element_type=jnp.float32) + b2d_ref[...]  # (TB, D)
    diff = x - xhat
    recon = (-0.5 * jnp.sum(diff * diff, axis=-1, keepdims=True)
             - 0.5 * D * LOG2PI)                                              # (TB, 1)

    # --- VampPrior MoG log prob: direct quadratic form on the VPU (numerically robust) ---
    mu_u = mu_u_ref[...]      # (K, Z)  component means = encoder(u).rsample()  (precomputed)
    ivar = ivar_ref[...]      # (K, Z)  1/(softplus(prior_var)+1e-8)            (precomputed)
    c1 = c1_ref[...]          # (1, K)  log_w - 0.5*sum_d log(var_p) - 0.5*Z*log(2pi)
    dz = z[:, None, :] - mu_u[None, :, :]                                     # (TB, K, Z)
    lpc = -0.5 * jnp.sum(dz * dz * ivar[None, :, :], axis=-1)                 # (TB, K)
    s_mix = c1 + lpc
    s_max = jnp.max(s_mix, axis=-1, keepdims=True)
    log_pz = jnp.log(jnp.sum(jnp.exp(s_mix - s_max), axis=-1, keepdims=True)) + s_max   # (TB, 1)

    # scalar accumulation across grid steps; batch mean happens in the wrapper
    out_ref[...] += jnp.sum(-recon + BETA * (log_q - log_pz), keepdims=True)  # (1, 1)


def vamp_vae_forward(x, eps_x, eps_u, u, prior_var, prior_pi, p):
    """Wrapper: hoist all x-independent math, then run the (usually single-step) kernel."""
    Bn, Dn = x.shape

    # Tile choice per perf review: whole batch in one tile at small B; at large B use TB>=128
    # (VMEM is not the constraint at these widths on v5e/v6e/v7x, MXU M-fill & overhead are).
    TB = Bn if Bn <= 512 else 512
    assert Bn % TB == 0, "batch must be divisible by the tile size"
    nt = Bn // TB

    # ---- x-independent precompute (prior branch + parameter-only math), hoisted out ----
    s_p = jax.nn.softplus(prior_var) + 1e-8                   # (K, Z) component variances
    ivar_p = 1.0 / s_p                                        # (K, Z)
    log_w = jax.nn.log_softmax(prior_pi)                      # (K,)
    c1 = (log_w - 0.5 * jnp.sum(jnp.log(s_p), axis=-1)
          - 0.5 * Z * LOG2PI).reshape(1, K)                   # (1, K)

    # encoder(u).rsample() -> mixture component means (depends only on params and eps_u)
    h_u = jnp.maximum(u @ p["w1e"] + p["b1e"], 0.0)
    enc_u = h_u @ p["w2e"] + p["b2e"]                         # (K, 2Z)
    std_u = jnp.sqrt(jax.nn.softplus(enc_u[:, Z:]) + 1e-8)
    mu_u = enc_u[:, :Z] + eps_u * std_u                       # (K, Z)

    args = (x, eps_x,
            p["w1e"], p["b1e"].reshape(1, -1),
            p["w2e"], p["b2e"].reshape(1, -1),
            p["w1d"], p["b1d"].reshape(1, -1),
            p["w2d"], p["b2d"].reshape(1, -1),
            mu_u, ivar_p, c1)

    def full_spec(a):
        # whole-array block; with nt==1 every parameter is DMA'd exactly once
        return pl.BlockSpec(a.shape, lambda i: (0, 0))

    in_specs = [
        pl.BlockSpec((TB, Dn), lambda i: (i, 0)),    # x     : tiled over batch
        pl.BlockSpec((TB, Z), lambda i: (i, 0)),     # eps_x : tiled over batch
    ] + [full_spec(a) for a in args[2:]]

    total = pl.pallas_call(
        vamp_vae_kernel,
        out_shape=jax.ShapeDtypeStruct((1, 1), jnp.float32),   # scalar sum of per-row losses
        grid=(nt,),
        in_specs=in_specs,
        out_specs=pl.BlockSpec((1, 1), lambda i: (0, 0)),      # revisited accumulator block
        compiler_params=pltpu.CompilerParams(dimension_semantics=("arbitrary",)),
    )(*args)
    return total[0, 0] / Bn


def ref_forward(x, eps_x, eps_u, u, prior_var, prior_pi, p):
    """Pure-JAX reference mirroring VampPriorMixtureVAE.forward semantics."""
    def enc(v):
        h = jnp.maximum(v @ p["w1e"] + p["b1e"], 0.0)
        o = h @ p["w2e"] + p["b2e"]
        return o[:, :Z], o[:, Z:]

    mu, var = enc(x)
    std = jnp.sqrt(jax.nn.softplus(var) + 1e-8)
    z = mu + eps_x * std
    hd = jnp.maximum(z @ p["w1d"] + p["b1d"], 0.0)
    xhat = hd @ p["w2d"] + p["b2d"]
    recon = jnp.sum(-0.5 * (x - xhat) ** 2 - 0.5 * LOG2PI, axis=-1)
    log_q = jnp.sum(-jnp.log(std) - 0.5 * LOG2PI - 0.5 * ((z - mu) / std) ** 2, axis=-1)

    # get_prior(): means = encoder(u).rsample(), stds = sqrt(softplus(prior_var)+1e-8), logits = prior_pi
    mu_u_m, var_u = enc(u)
    std_u = jnp.sqrt(jax.nn.softplus(var_u) + 1e-8)
    mu_u = mu_u_m + eps_u * std_u
    std_p = jnp.sqrt(jax.nn.softplus(prior_var) + 1e-8)
    lpc = jnp.sum(-jnp.log(std_p)[None] - 0.5 * LOG2PI
                  - 0.5 * ((z[:, None, :] - mu_u[None]) / std_p[None]) ** 2, axis=-1)
    log_w = jax.nn.log_softmax(prior_pi)
    log_pz = jax.scipy.special.logsumexp(log_w[None, :] + lpc, axis=-1)
    return -jnp.mean(recon) + BETA * jnp.mean(log_q - log_pz)


if __name__ == "__main__":
    key = jax.random.PRNGKey(0)
    ks = jax.random.split(key, 12)

    # deterministic synthetic parameters (no checkpoint / dataloader)
    params = {
        "w1e": jax.random.normal(ks[0], (D, H), jnp.float32) * 0.1,
        "b1e": jnp.zeros((H,), jnp.float32),
        "w2e": jax.random.normal(ks[1], (H, 2 * Z), jnp.float32) * 0.1,
        "b2e": jnp.zeros((2 * Z,), jnp.float32),
        "w1d": jax.random.normal(ks[2], (Z, H), jnp.float32) * 0.1,
        "b1d": jnp.zeros((H,), jnp.float32),
        "w2d": jax.random.normal(ks[3], (H, D), jnp.float32) * 0.1,
        "b2d": jnp.zeros((D,), jnp.float32),
    }
    # VampPriorMixtureVAE.__init__: u ~ U[0,1) (K,D); prior_var ~ N(0,1) (K,Z); prior_pi = zeros(K)
    u = jax.random.uniform(ks[4], (K, D), jnp.float32)
    prior_var = jax.random.normal(ks[5], (K, Z), jnp.float32)
    prior_pi = jnp.zeros((K,), jnp.float32)

    # inputs + reparameterization noise (rsample noise drawn outside the kernel)
    x = jax.random.normal(ks[6], (B, D), jnp.float32)
    eps_x = jax.random.normal(ks[7], (B, Z), jnp.float32)   # q(z|x).rsample noise
    eps_u = jax.random.normal(ks[8], (K, Z), jnp.float32)   # encoder(u).rsample noise in get_prior()

    loss = jax.block_until_ready(vamp_vae_forward(x, eps_x, eps_u, u, prior_var, prior_pi, params))
    loss_ref = jax.block_until_ready(ref_forward(x, eps_x, eps_u, u, prior_var, prior_pi, params))
    np.testing.assert_allclose(np.asarray(loss), np.asarray(loss_ref), rtol=1e-3, atol=1e-3)

    # TODO(synk): MixtureOfGaussians.rsample (Gumbel-softmax), sample()/pca_prior()/pca_posterior()
    # and sample_from_dataloader() are not part of forward() and are not implemented here.
    print("KERNEL_OK")
</pallas_src>

<mosaic_0001>
module attributes {stable_mosaic.version = 11 : i64} {
  func.func @vamp_vae_kernel(%arg0: i32, %arg1: memref<16x32xf32, #tpu.memory_space<vmem>>, %arg2: memref<16x16xf32, #tpu.memory_space<vmem>>, %arg3: memref<32x32xf32, #tpu.memory_space<vmem>>, %arg4: memref<1x32xf32, #tpu.memory_space<vmem>>, %arg5: memref<32x32xf32, #tpu.memory_space<vmem>>, %arg6: memref<1x32xf32, #tpu.memory_space<vmem>>, %arg7: memref<16x32xf32, #tpu.memory_space<vmem>>, %arg8: memref<1x32xf32, #tpu.memory_space<vmem>>, %arg9: memref<32x32xf32, #tpu.memory_space<vmem>>, %arg10: memref<1x32xf32, #tpu.memory_space<vmem>>, %arg11: memref<8x16xf32, #tpu.memory_space<vmem>>, %arg12: memref<8x16xf32, #tpu.memory_space<vmem>>, %arg13: memref<1x8xf32, #tpu.memory_space<vmem>>, %arg14: memref<1x1xf32, #tpu.memory_space<vmem>>) attributes {dimension_semantics = [#tpu.dimension_semantics<arbitrary>], iteration_bounds = array<i64: 1>, scalar_prefetch = 0 : i64, scratch_operands = 0 : i64, tpu.core_type = #tpu.core_type<tc>, window_params = [{transform_indices = @transform_0, window_bounds = array<i64: 16, 32>}, {transform_indices = @transform_1, window_bounds = array<i64: 16, 16>}, {pipeline_mode = #tpu.pipeline_mode<synchronous>, transform_indices = @transform_2, window_bounds = array<i64: 32, 32>}, {pipeline_mode = #tpu.pipeline_mode<synchronous>, transform_indices = @transform_3, window_bounds = array<i64: 1, 32>}, {pipeline_mode = #tpu.pipeline_mode<synchronous>, transform_indices = @transform_4, window_bounds = array<i64: 32, 32>}, {pipeline_mode = #tpu.pipeline_mode<synchronous>, transform_indices = @transform_5, window_bounds = array<i64: 1, 32>}, {pipeline_mode = #tpu.pipeline_mode<synchronous>, transform_indices = @transform_6, window_bounds = array<i64: 16, 32>}, {pipeline_mode = #tpu.pipeline_mode<synchronous>, transform_indices = @transform_7, window_bounds = array<i64: 1, 32>}, {pipeline_mode = #tpu.pipeline_mode<synchronous>, transform_indices = @transform_8, window_bounds = array<i64: 32, 32>}, {pipeline_mode = #tpu.pipeline_mode<synchronous>, transform_indices = @transform_9, window_bounds = array<i64: 1, 32>}, {pipeline_mode = #tpu.pipeline_mode<synchronous>, transform_indices = @transform_10, window_bounds = array<i64: 8, 16>}, {pipeline_mode = #tpu.pipeline_mode<synchronous>, transform_indices = @transform_11, window_bounds = array<i64: 8, 16>}, {pipeline_mode = #tpu.pipeline_mode<synchronous>, transform_indices = @transform_12, window_bounds = array<i64: 1, 8>}, {pipeline_mode = #tpu.pipeline_mode<synchronous>, transform_indices = @transform_13, window_bounds = array<i64: 1, 1>}]} {
    %c0_i32 = arith.constant 0 : i32
    %0 = arith.cmpi eq, %arg0, %c0_i32 : i32
    %1 = arith.extui %0 : i1 to i32
    %c0_i32_0 = arith.constant 0 : i32
    %2 = arith.cmpi ne, %1, %c0_i32_0 : i32
    scf.if %2 {
      %cst_53 = arith.constant 0.000000e+00 : f32
      %111 = vector.broadcast %cst_53 : f32 to vector<1x1xf32>
      %c0_54 = arith.constant 0 : index
      %c0_55 = arith.constant 0 : index
      %112 = vector.load %arg14[%c0_54, %c0_55] : memref<1x1xf32, #tpu.memory_space<vmem>>, vector<1x1xf32>
      tpu.vector_store %arg14[%c0_54, %c0_55], %111 {strides = array<i32>} : memref<1x1xf32, #tpu.memory_space<vmem>>, vector<1x1xf32>,
    } else {
    }
    %c0 = arith.constant 0 : index
    %c0_1 = arith.constant 0 : index
    %3 = vector.load %arg1[%c0, %c0_1] : memref<16x32xf32, #tpu.memory_space<vmem>>, vector<16x32xf32>
    %c0_2 = arith.constant 0 : index
    %c0_3 = arith.constant 0 : index
    %4 = vector.load %arg2[%c0_2, %c0_3] : memref<16x16xf32, #tpu.memory_space<vmem>>, vector<16x16xf32>
    %c0_4 = arith.constant 0 : index
    %c0_5 = arith.constant 0 : index
    %5 = vector.load %arg3[%c0_4, %c0_5] : memref<32x32xf32, #tpu.memory_space<vmem>>, vector<32x32xf32>
    %cst = arith.constant dense<0.000000e+00> : vector<16x32xf32>
    %6 = tpu.matmul %3, %5, %cst {dimension_numbers = #tpu.dot_dimension_numbers<[1], [0], [0], [1], [0, 0, 1, 1], [], []>} : vector<16x32xf32>, vector<32x32xf32>, vector<16x32xf32> -> vector<16x32xf32>
    %c0_6 = arith.constant 0 : index
    %c0_7 = arith.constant 0 : index
    %7 = vector.load %arg4[%c0_6, %c0_7] : memref<1x32xf32, #tpu.memory_space<vmem>>, vector<1x32xf32>
    %8 = vector.broadcast %7 : vector<1x32xf32> to vector<16x32xf32>
    %9 = arith.addf %6, %8 : vector<16x32xf32>
    %cst_8 = arith.constant 0.000000e+00 : f32
    %10 = vector.broadcast %cst_8 : f32 to vector<16x32xf32>
    %11 = arith.maximumf %9, %10 : vector<16x32xf32>
    %c0_9 = arith.constant 0 : index
    %c0_10 = arith.constant 0 : index
    %12 = vector.load %arg5[%c0_9, %c0_10] : memref<32x32xf32, #tpu.memory_space<vmem>>, vector<32x32xf32>
    %cst_11 = arith.constant dense<0.000000e+00> : vector<16x32xf32>
    %13 = tpu.matmul %11, %12, %cst_11 {dimension_numbers = #tpu.dot_dimension_numbers<[1], [0], [0], [1], [0, 0, 1, 1], [], []>} : vector<16x32xf32>, vector<32x32xf32>, vector<16x32xf32> -> vector<16x32xf32>
    %c0_12 = arith.constant 0 : index
    %c0_13 = arith.constant 0 : index
    %14 = vector.load %arg6[%c0_12, %c0_13] : memref<1x32xf32, #tpu.memory_space<vmem>>, vector<1x32xf32>
    %15 = vector.broadcast %14 : vector<1x32xf32> to vector<16x32xf32>
    %16 = arith.addf %13, %15 : vector<16x32xf32>
    %17 = vector.extract_strided_slice %16 {offsets = [0, 0], sizes = [16, 16], strides = [1, 1]} : vector<16x32xf32> to vector<16x16xf32>
    %18 = vector.extract_strided_slice %16 {offsets = [0, 16], sizes = [16, 16], strides = [1, 1]} : vector<16x32xf32> to vector<16x16xf32>
    %cst_14 = arith.constant 0.000000e+00 : f32
    %19 = vector.broadcast %cst_14 : f32 to vector<16x16xf32>
    %20 = arith.maximumf %18, %19 : vector<16x16xf32>
    %21 = vector.broadcast %cst_14 : f32 to vector<16x16xf32>
    %22 = arith.subf %18, %21 : vector<16x16xf32>
    %23 = arith.cmpf one, %22, %22 : vector<16x16xf32>
    %24 = vector.broadcast %cst_14 : f32 to vector<16x16xf32>
    %25 = arith.addf %18, %24 : vector<16x16xf32>
    %26 = math.absf %22 : vector<16x16xf32>
    %cst_15 = arith.constant 0.000000e+00 : f32
    %27 = vector.broadcast %cst_15 : f32 to vector<16x16xf32>
    %28 = arith.subf %27, %26 : vector<16x16xf32>
    %29 = math.exp %28 : vector<16x16xf32>
    %30 = math.log1p %29 : vector<16x16xf32>
    %31 = arith.addf %20, %30 : vector<16x16xf32>
    %32 = arith.select %23, %25, %31 : vector<16x16xi1>, vector<16x16xf32>
    %cst_16 = arith.constant 9.99999993E-9 : f32
    %33 = vector.broadcast %cst_16 : f32 to vector<16x16xf32>
    %34 = arith.addf %32, %33 : vector<16x16xf32>
    %35 = math.sqrt %34 : vector<16x16xf32>
    %36 = arith.mulf %4, %35 : vector<16x16xf32>
    %37 = arith.addf %17, %36 : vector<16x16xf32>
    %38 = math.log %34 : vector<16x16xf32>
    %cst_17 = arith.constant dense<0.000000e+00> : vector<16xf32>
    %39 = vector.multi_reduction <add>, %38, %cst_17 [1] : vector<16x16xf32> to vector<16xf32>
    %40 = vector.shape_cast %39 : vector<16xf32> to vector<16x1xf32>
    %cst_18 = arith.constant -5.000000e-01 : f32
    %41 = vector.broadcast %cst_18 : f32 to vector<16x1xf32>
    %42 = arith.mulf %41, %40 : vector<16x1xf32>
    %cst_19 = arith.constant 14.7030163 : f32
    %43 = vector.broadcast %cst_19 : f32 to vector<16x1xf32>
    %44 = arith.subf %42, %43 : vector<16x1xf32>
    %45 = arith.mulf %4, %4 : vector<16x16xf32>
    %cst_20 = arith.constant dense<0.000000e+00> : vector<16xf32>
    %46 = vector.multi_reduction <add>, %45, %cst_20 [1] : vector<16x16xf32> to vector<16xf32>
    %47 = vector.shape_cast %46 : vector<16xf32> to vector<16x1xf32>
    %cst_21 = arith.constant 5.000000e-01 : f32
    %48 = vector.broadcast %cst_21 : f32 to vector<16x1xf32>
    %49 = arith.mulf %48, %47 : vector<16x1xf32>
    %50 = arith.subf %44, %49 : vector<16x1xf32>
    %c0_22 = arith.constant 0 : index
    %c0_23 = arith.constant 0 : index
    %51 = vector.load %arg7[%c0_22, %c0_23] : memref<16x32xf32, #tpu.memory_space<vmem>>, vector<16x32xf32>
    %cst_24 = arith.constant dense<0.000000e+00> : vector<16x32xf32>
    %52 = tpu.matmul %37, %51, %cst_24 {dimension_numbers = #tpu.dot_dimension_numbers<[1], [0], [0], [1], [0, 0, 1, 1], [], []>} : vector<16x16xf32>, vector<16x32xf32>, vector<16x32xf32> -> vector<16x32xf32>
    %c0_25 = arith.constant 0 : index
    %c0_26 = arith.constant 0 : index
    %53 = vector.load %arg8[%c0_25, %c0_26] : memref<1x32xf32, #tpu.memory_space<vmem>>, vector<1x32xf32>
    %54 = vector.broadcast %53 : vector<1x32xf32> to vector<16x32xf32>
    %55 = arith.addf %52, %54 : vector<16x32xf32>
    %cst_27 = arith.constant 0.000000e+00 : f32
    %56 = vector.broadcast %cst_27 : f32 to vector<16x32xf32>
    %57 = arith.maximumf %55, %56 : vector<16x32xf32>
    %c0_28 = arith.constant 0 : index
    %c0_29 = arith.constant 0 : index
    %58 = vector.load %arg9[%c0_28, %c0_29] : memref<32x32xf32, #tpu.memory_space<vmem>>, vector<32x32xf32>
    %cst_30 = arith.constant dense<0.000000e+00> : vector<16x32xf32>
    %59 = tpu.matmul %57, %58, %cst_30 {dimension_numbers = #tpu.dot_dimension_numbers<[1], [0], [0], [1], [0, 0, 1, 1], [], []>} : vector<16x32xf32>, vector<32x32xf32>, vector<16x32xf32> -> vector<16x32xf32>
    %c0_31 = arith.constant 0 : index
    %c0_32 = arith.constant 0 : index
    %60 = vector.load %arg10[%c0_31, %c0_32] : memref<1x32xf32, #tpu.memory_space<vmem>>, vector<1x32xf32>
    %61 = vector.broadcast %60 : vector<1x32xf32> to vector<16x32xf32>
    %62 = arith.addf %59, %61 : vector<16x32xf32>
    %63 = arith.subf %3, %62 : vector<16x32xf32>
    %64 = arith.mulf %63, %63 : vector<16x32xf32>
    %cst_33 = arith.constant dense<0.000000e+00> : vector<16xf32>
    %65 = vector.multi_reduction <add>, %64, %cst_33 [1] : vector<16x32xf32> to vector<16xf32>
    %66 = vector.shape_cast %65 : vector<16xf32> to vector<16x1xf32>
    %cst_34 = arith.constant -5.000000e-01 : f32
    %67 = vector.broadcast %cst_34 : f32 to vector<16x1xf32>
    %68 = arith.mulf %67, %66 : vector<16x1xf32>
    %cst_35 = arith.constant 29.4060326 : f32
    %69 = vector.broadcast %cst_35 : f32 to vector<16x1xf32>
    %70 = arith.subf %68, %69 : vector<16x1xf32>
    %c0_36 = arith.constant 0 : index
    %c0_37 = arith.constant 0 : index
    %71 = vector.load %arg11[%c0_36, %c0_37] : memref<8x16xf32, #tpu.memory_space<vmem>>, vector<8x16xf32>
    %c0_38 = arith.constant 0 : index
    %c0_39 = arith.constant 0 : index
    %72 = vector.load %arg12[%c0_38, %c0_39] : memref<8x16xf32, #tpu.memory_space<vmem>>, vector<8x16xf32>
    %c0_40 = arith.constant 0 : index
    %c0_41 = arith.constant 0 : index
    %73 = vector.load %arg13[%c0_40, %c0_41] : memref<1x8xf32, #tpu.memory_space<vmem>>, vector<1x8xf32>
    %74 = vector.shape_cast %37 : vector<16x16xf32> to vector<16x1x16xf32>
    %75 = vector.shape_cast %71 : vector<8x16xf32> to vector<1x8x16xf32>
    %76 = vector.broadcast %74 : vector<16x1x16xf32> to vector<16x8x16xf32>
    %77 = vector.broadcast %75 : vector<1x8x16xf32> to vector<16x8x16xf32>
    %78 = arith.subf %76, %77 : vector<16x8x16xf32>
    %79 = arith.mulf %78, %78 : vector<16x8x16xf32>
    %80 = vector.shape_cast %72 : vector<8x16xf32> to vector<1x8x16xf32>
    %81 = vector.broadcast %80 : vector<1x8x16xf32> to vector<16x8x16xf32>
    %82 = arith.mulf %79, %81 : vector<16x8x16xf32>
    %cst_42 = arith.constant dense<0.000000e+00> : vector<16x8xf32>
    %83 = vector.multi_reduction <add>, %82, %cst_42 [2] : vector<16x8x16xf32> to vector<16x8xf32>
    %cst_43 = arith.constant -5.000000e-01 : f32
    %84 = vector.broadcast %cst_43 : f32 to vector<16x8xf32>
    %85 = arith.mulf %84, %83 : vector<16x8xf32>
    %86 = vector.broadcast %73 : vector<1x8xf32> to vector<16x8xf32>
    %87 = arith.addf %86, %85 : vector<16x8xf32>
    %cst_44 = arith.constant dense<0xFF800000> : vector<16xf32>
    %88 = vector.multi_reduction <maximumf>, %87, %cst_44 [1] : vector<16x8xf32> to vector<16xf32>
    %89 = vector.shape_cast %88 : vector<16xf32> to vector<16x1xf32>
    %90 = vector.broadcast %89 : vector<16x1xf32> to vector<16x8xf32>
    %91 = arith.subf %87, %90 : vector<16x8xf32>
    %92 = math.exp %91 : vector<16x8xf32>
    %cst_45 = arith.constant dense<0.000000e+00> : vector<16xf32>
    %93 = vector.multi_reduction <add>, %92, %cst_45 [1] : vector<16x8xf32> to vector<16xf32>
    %94 = vector.shape_cast %93 : vector<16xf32> to vector<16x1xf32>
    %95 = math.log %94 : vector<16x1xf32>
    %96 = arith.addf %95, %89 : vector<16x1xf32>
    %c0_46 = arith.constant 0 : index
    %c0_47 = arith.constant 0 : index
    %97 = vector.load %arg14[%c0_46, %c0_47] : memref<1x1xf32, #tpu.memory_space<vmem>>, vector<1x1xf32>
    %cst_48 = arith.constant 0.000000e+00 : f32
    %98 = vector.broadcast %cst_48 : f32 to vector<16x1xf32>
    %99 = arith.subf %98, %70 : vector<16x1xf32>
    %100 = arith.subf %50, %96 : vector<16x1xf32>
    %cst_49 = arith.constant 1.000000e+00 : f32
    %101 = vector.broadcast %cst_49 : f32 to vector<16x1xf32>
    %102 = arith.mulf %101, %100 : vector<16x1xf32>
    %103 = arith.addf %99, %102 : vector<16x1xf32>
    %104 = vector.shape_cast %103 : vector<16x1xf32> to vector<1x16x1xf32>
    %cst_50 = arith.constant dense<0.000000e+00> : vector<1xf32>
    %105 = vector.multi_reduction <add>, %104, %cst_50 [1, 2] : vector<1x16x1xf32> to vector<1xf32>
    %106 = vector.shape_cast %105 : vector<1xf32> to vector<1x1x1xf32>
    %107 = vector.extract %106[0, 0, 0] : f32 from vector<1x1x1xf32>
    %108 = vector.broadcast %107 : f32 to vector<1x1xf32>
    %109 = arith.addf %97, %108 : vector<1x1xf32>
    %c0_51 = arith.constant 0 : index
    %c0_52 = arith.constant 0 : index
    %110 = vector.load %arg14[%c0_51, %c0_52] : memref<1x1xf32, #tpu.memory_space<vmem>>, vector<1x1xf32>
    tpu.vector_store %arg14[%c0_51, %c0_52], %109 {strides = array<i32>} : memref<1x1xf32, #tpu.memory_space<vmem>>, vector<1x1xf32>,
    return
  }
  func.func @transform_0(%arg0: i32) -> (i32, i32) {
    %c0_i32 = arith.constant 0 : i32
    %c0_i32_0 = arith.constant 0 : i32
    return %arg0, %c0_i32 : i32, i32
  }
  func.func @transform_1(%arg0: i32) -> (i32, i32) {
    %c0_i32 = arith.constant 0 : i32
    %c0_i32_0 = arith.constant 0 : i32
    return %arg0, %c0_i32 : i32, i32
  }
  func.func @transform_2(%arg0: i32) -> (i32, i32) {
    %c0_i32 = arith.constant 0 : i32
    %c0_i32_0 = arith.constant 0 : i32
    %c0_i32_1 = arith.constant 0 : i32
    return %c0_i32, %c0_i32_0 : i32, i32
  }
  func.func @transform_3(%arg0: i32) -> (i32, i32) {
    %c0_i32 = arith.constant 0 : i32
    %c0_i32_0 = arith.constant 0 : i32
    %c0_i32_1 = arith.constant 0 : i32
    return %c0_i32, %c0_i32_0 : i32, i32
  }
  func.func @transform_4(%arg0: i32) -> (i32, i32) {
    %c0_i32 = arith.constant 0 : i32
    %c0_i32_0 = arith.constant 0 : i32
    %c0_i32_1 = arith.constant 0 : i32
    return %c0_i32, %c0_i32_0 : i32, i32
  }
  func.func @transform_5(%arg0: i32) -> (i32, i32) {
    %c0_i32 = arith.constant 0 : i32
    %c0_i32_0 = arith.constant 0 : i32
    %c0_i32_1 = arith.constant 0 : i32
    return %c0_i32, %c0_i32_0 : i32, i32
  }
  func.func @transform_6(%arg0: i32) -> (i32, i32) {
    %c0_i32 = arith.constant 0 : i32
    %c0_i32_0 = arith.constant 0 : i32
    %c0_i32_1 = arith.constant 0 : i32
    return %c0_i32, %c0_i32_0 : i32, i32
  }
  func.func @transform_7(%arg0: i32) -> (i32, i32) {
    %c0_i32 = arith.constant 0 : i32
    %c0_i32_0 = arith.constant 0 : i32
    %c0_i32_1 = arith.constant 0 : i32
    return %c0_i32, %c0_i32_0 : i32, i32
  }
  func.func @transform_8(%arg0: i32) -> (i32, i32) {
    %c0_i32 = arith.constant 0 : i32
    %c0_i32_0 = arith.constant 0 : i32
    %c0_i32_1 = arith.constant 0 : i32
    return %c0_i32, %c0_i32_0 : i32, i32
  }
  func.func @transform_9(%arg0: i32) -> (i32, i32) {
    %c0_i32 = arith.constant 0 : i32
    %c0_i32_0 = arith.constant 0 : i32
    %c0_i32_1 = arith.constant 0 : i32
    return %c0_i32, %c0_i32_0 : i32, i32
  }
  func.func @transform_10(%arg0: i32) -> (i32, i32) {
    %c0_i32 = arith.constant 0 : i32
    %c0_i32_0 = arith.constant 0 : i32
    %c0_i32_1 = arith.constant 0 : i32
    return %c0_i32, %c0_i32_0 : i32, i32
  }
  func.func @transform_11(%arg0: i32) -> (i32, i32) {
    %c0_i32 = arith.constant 0 : i32
    %c0_i32_0 = arith.constant 0 : i32
    %c0_i32_1 = arith.constant 0 : i32
    return %c0_i32, %c0_i32_0 : i32, i32
  }
  func.func @transform_12(%arg0: i32) -> (i32, i32) {
    %c0_i32 = arith.constant 0 : i32
    %c0_i32_0 = arith.constant 0 : i32
    %c0_i32_1 = arith.constant 0 : i32
    return %c0_i32, %c0_i32_0 : i32, i32
  }
  func.func @transform_13(%arg0: i32) -> (i32, i32) {
    %c0_i32 = arith.constant 0 : i32
    %c0_i32_0 = arith.constant 0 : i32
    %c0_i32_1 = arith.constant 0 : i32
    return %c0_i32, %c0_i32_0 : i32, i32
  }
}

</mosaic_0001>

<bundles_post_ra>
// kernel: tpu_custom_call.1
= control target key start
LH: loop header
LB: loop body
LE: loop exit
PB: predicated region body
PF: predicated region fallthrough
CT: control target
= control target key end

     0   :  { %18 = vsyncpa [#allocation3], 0  ;;  %s1876_s0 = inlined_call_operand.hbm [shape: f32[16,32], index: 0, kind: input, shape index: {}]   ;;  %s1877_s1 = inlined_call_operand.hbm [shape: f32[16,16], index: 1, kind: input, shape index: {}]   ;;  %s1878_s2 = inlined_call_operand.hbm [shape: f32[32,32], index: 2, kind: input, shape index: {}]   ;;  %s1879_s3 = inlined_call_operand.vmem [shape: f32[1,32], index: 3, kind: input, shape index: {}]   ;;  %s1880_s4 = inlined_call_operand.hbm [shape: f32[32,32], index: 4, kind: input, shape index: {}]   ;;  %s1881_s5 = inlined_call_operand.vmem [shape: f32[1,32], index: 5, kind: input, shape index: {}]   ;;  %s1882_s6 = inlined_call_operand.vmem [shape: f32[16,32], index: 6, kind: input, shape index: {}]   ;;  %s1883_s7 = inlined_call_operand.hbm [shape: f32[1,32], index: 7, kind: input, shape index: {}]   ;;  %s1884_s8 = inlined_call_operand.hbm [shape: f32[32,32], index: 8, kind: input, shape index: {}]   ;;  %s1885_s9 = inlined_call_operand.hbm [shape: f32[1,32], index: 9, kind: input, shape index: {}]   ;;  %s1886_s10 = inlined_call_operand.vmem [shape: f32[8,16], index: 10, kind: input, shape index: {}]   ;;  %s1887_s11 = inlined_call_operand.vmem [shape: f32[8,16], index: 11, kind: input, shape index: {}]   ;;  %s1888_s12 = inlined_call_operand.vmem [shape: f32[1,8], index: 12, kind: input, shape index: {}]   ;;  %s1889_s13 = inlined_call_operand.hbm [shape: f32[1,1], index: 13, kind: output, shape index: {}]  }
   0x1   :  { %19 = vsyncpa [#allocation6], 0 }
   0x2   :  { %20 = vsyncpa [#allocation9], 0 }
   0x3   :  { %21 = vsyncpa [#allocation12], 0 }
   0x4   :  { %22 = vsyncpa [#allocation4], 0  ;;  %s1435_s25 = smov [#allocation5]   ;;  %s1436_s27 = smov [#allocation8]  }
   0x5   :  { %s40_s26 = sshll.u32 %s1435_s25, 4  ;;  %s66_s28 = sshll.u32 %s1436_s27, 4  ;;  %s41_s26 = int_to_ptr.vmem [resolvable:$true] %s40_s26  ;;  %s1518_s28 = int_to_ptr.vmem [resolvable:$true] %s66_s28 }
   0x6   :  { %s1249_s14 = scalar_lea.hbm %s1877_s1, 256 }
   0x7   :  { %p1250_p0 = scmp.ne.s32.totalorder %s1877_s1, %s1249_s14  ;;  %p1253_p1 = scmp.lt.u32.totalorder %s1249_s14, %s1877_s1 }
   0x9   :  { %p1255_p2 = pnand %p1253_p1, %p1250_p0 }
   0xb   :  { %1258 = shalt.err (!%p1255_p2)
}
   0xc   :  { %s1259_s19 = scalar_lea.vmem %s41_s26, 256  ;;  %p1264_p4 = scmp.lt.s32.totalorder %s41_s26, %s41_s26 }
   0xd   :  { %p1260_p3 = scmp.ne.s32.totalorder %s41_s26, %s1259_s19  ;;  %p1265_p5 = scmp.lt.s32.totalorder %s1259_s19, %s1259_s19 }
   0xf   :  { %p1266_p6 = por %p1265_p5, %p1264_p4 }
  0x11   :  { %p1267_p7 = pnand %p1266_p6, %p1260_p3 }
  0x13   :  { %1270 = shalt.err (!%p1267_p7)
}
  0x14   :  { %s1437_s20 = smov 128   ;;  %s1438_s21 = smov 8  }
  0x15   :  { %46 = dma.hbm_to_vmem [thread:$0]  %s1877_s1, 256, %s41_s26, [#allocation6], %s1437_s20, %s1437_s20, %s1438_s21  }
  0x16   :  { %s1271_s27 = scalar_lea.hbm %s1880_s4, 512 }
  0x17   :  { %p1272_p8 = scmp.ne.s32.totalorder %s1880_s4, %s1271_s27  ;;  %p1275_p9 = scmp.lt.u32.totalorder %s1271_s27, %s1880_s4 }
  0x19   :  { %p1277_p10 = pnand %p1275_p9, %p1272_p8 }
  0x1b   :  { %1280 = shalt.err (!%p1277_p10)
}
  0x1c   :  { %s1281_s16 = scalar_lea.vmem %s1518_s28, 512  ;;  %p1286_p12 = scmp.lt.s32.totalorder %s1518_s28, %s1518_s28 }
  0x1d   :  { %p1282_p11 = scmp.ne.s32.totalorder %s1518_s28, %s1281_s16  ;;  %p1287_p13 = scmp.lt.s32.totalorder %s1281_s16, %s1281_s16 }
  0x1f   :  { %p1288_p0 = por %p1287_p13, %p1286_p12 }
  0x21   :  { %p1289_p1 = pnand %p1288_p0, %p1282_p11 }
  0x23   :  { %1292 = shalt.err (!%p1289_p1)
}
  0x24   :  { %72 = dma.hbm_to_vmem [thread:$0]  %s1880_s4, 512, %s1518_s28, [#allocation9], %s1437_s20, %s1437_s20, %s1438_s21  }
  0x25   :  { %s1439_s17 = smov [#allocation11]   ;;  %s1440_s19 = smov [#allocation2]  }
  0x26   :  { %s92_s18 = sshll.u32 %s1439_s17, 4  ;;  %s28_s22 = sshll.u32 %s1440_s19, 4  ;;  %s93_s18 = int_to_ptr.vmem [resolvable:$true] %s92_s18  ;;  %s1555_s22 = int_to_ptr.vmem [resolvable:$true] %s28_s22 }
  0x27   :  { %s1293_s25 = scalar_lea.hbm %s1884_s8, 512 }
  0x28   :  { %p1294_p2 = scmp.ne.s32.totalorder %s1884_s8, %s1293_s25  ;;  %p1297_p3 = scmp.lt.u32.totalorder %s1293_s25, %s1884_s8 }
  0x2a   :  { %p1299_p4 = pnand %p1297_p3, %p1294_p2 }
  0x2c   :  { %1302 = shalt.err (!%p1299_p4)
}
  0x2d   :  { %s1303_s4 = scalar_lea.vmem %s93_s18, 512  ;;  %p1308_p6 = scmp.lt.s32.totalorder %s93_s18, %s93_s18 }
  0x2e   :  { %p1304_p5 = scmp.ne.s32.totalorder %s93_s18, %s1303_s4  ;;  %p1309_p7 = scmp.lt.s32.totalorder %s1303_s4, %s1303_s4 }
  0x30   :  { %p1310_p8 = por %p1309_p7, %p1308_p6 }
  0x32   :  { %p1311_p9 = pnand %p1310_p8, %p1304_p5 }
  0x34   :  { %1314 = shalt.err (!%p1311_p9)
}
  0x35   :  { %98 = dma.hbm_to_vmem [thread:$0]  %s1884_s8, 512, %s93_s18, [#allocation12], %s1437_s20, %s1437_s20, %s1438_s21  }
  0x36   :  { %s1315_s26 = scalar_lea.hbm %s1876_s0, 256 }
  0x37   :  { %p1316_p10 = scmp.ne.s32.totalorder %s1876_s0, %s1315_s26  ;;  %p1319_p11 = scmp.lt.u32.totalorder %s1315_s26, %s1876_s0 }
  0x39   :  { %p1321_p12 = pnand %p1319_p11, %p1316_p10 }
  0x3b   :  { %1324 = shalt.err (!%p1321_p12)
}
  0x3c   :  { %s1325_s25 = scalar_lea.vmem %s1555_s22, 256  ;;  %p1330_p0 = scmp.lt.s32.totalorder %s1555_s22, %s1555_s22 }
  0x3d   :  { %p1326_p13 = scmp.ne.s32.totalorder %s1555_s22, %s1325_s25  ;;  %p1331_p1 = scmp.lt.s32.totalorder %s1325_s25, %s1325_s25 }
  0x3f   :  { %p1332_p2 = por %p1331_p1, %p1330_p0 }
  0x41   :  { %p1333_p3 = pnand %p1332_p2, %p1326_p13 }
  0x43   :  { %1336 = shalt.err (!%p1333_p3)
}
  0x44   :  { %34 = dma.hbm_to_vmem [thread:$0]  %s1876_s0, 256, %s1555_s22, [#allocation3], %s1437_s20, %s1437_s20, %s1438_s21  }
  0x45   :  { %s1441_s27 = smov [#allocation7]   ;;  %s1442_s30 = smov [#allocation10]  }
  0x46   :  { %s52_s29 = sshll.u32 %s1441_s27, 4  ;;  %s83_s14 = sshll.u32 %s1442_s30, 4  ;;  %s53_s29 = int_to_ptr.vmem [resolvable:$true] %s52_s29  ;;  %s84_s14 = int_to_ptr.vmem [resolvable:$true] %s83_s14 }
  0x47   :  { %s1337_s15 = scalar_lea.hbm %s1878_s2, 512 }
  0x48   :  { %p1338_p4 = scmp.ne.s32.totalorder %s1878_s2, %s1337_s15  ;;  %p1341_p5 = scmp.lt.u32.totalorder %s1337_s15, %s1878_s2 }
  0x4a   :  { %p1343_p6 = pnand %p1341_p5, %p1338_p4 }
  0x4c   :  { %1346 = shalt.err (!%p1343_p6)
}
  0x4d   :  { %s1347_s0 = scalar_lea.vmem %s53_s29, 512  ;;  %p1352_p8 = scmp.lt.s32.totalorder %s53_s29, %s53_s29 }
  0x4e   :  { %p1348_p7 = scmp.ne.s32.totalorder %s53_s29, %s1347_s0  ;;  %p1353_p9 = scmp.lt.s32.totalorder %s1347_s0, %s1347_s0 }
  0x50   :  { %p1354_p10 = por %p1353_p9, %p1352_p8 }
  0x52   :  { %p1355_p11 = pnand %p1354_p10, %p1348_p7 }
  0x54   :  { %1358 = shalt.err (!%p1355_p11)
}
  0x55   :  { %58 = dma.hbm_to_vmem [thread:$0]  %s1878_s2, 512, %s53_s29, [#allocation6], %s1437_s20, %s1437_s20, %s1438_s21  }
  0x56   :  { %s1359_s25 = scalar_lea.hbm %s1883_s7, 16 }
  0x57   :  { %p1360_p12 = scmp.ne.s32.totalorder %s1883_s7, %s1359_s25  ;;  %p1363_p13 = scmp.lt.u32.totalorder %s1359_s25, %s1883_s7 }
  0x59   :  { %p1365_p0 = pnand %p1363_p13, %p1360_p12 }
  0x5b   :  { %1368 = shalt.err (!%p1365_p0)
}
  0x5c   :  { %s1369_s4 = scalar_lea.vmem %s84_s14, 16  ;;  %s1373_s28 = scalar_lea.vmem %s84_s14, 32 }
  0x5d   :  { %p1370_p1 = scmp.ne.s32.totalorder %s84_s14, %s1369_s4  ;;  %p1374_p2 = scmp.lt.s32.totalorder %s84_s14, %s84_s14 }
  0x5e   :  { %p1375_p3 = scmp.lt.s32.totalorder %s1373_s28, %s1369_s4 }
  0x60   :  { %p1376_p4 = por %p1375_p3, %p1374_p2 }
  0x62   :  { %p1377_p5 = pnand %p1376_p4, %p1370_p1 }
  0x64   :  { %1380 = shalt.err (!%p1377_p5)
}
  0x65   :  { %86 = dma.hbm_to_vmem [thread:$0]  %s1883_s7, 16, %s84_s14, [#allocation9]  }
  0x66   :  { %s1443_s21 = smov [#allocation13]   ;;  %s1381_s1 = scalar_lea.hbm %s1885_s9, 16 }
  0x67   :  { %s105_s29 = sshll.u32 %s1443_s21, 4  ;;  %p1382_p6 = scmp.ne.s32.totalorder %s1885_s9, %s1381_s1  ;;  %s106_s29 = int_to_ptr.vmem [resolvable:$true] %s105_s29 }
  0x68   :  { %p1385_p7 = scmp.lt.u32.totalorder %s1381_s1, %s1885_s9 }
  0x6a   :  { %p1387_p8 = pnand %p1385_p7, %p1382_p6 }
  0x6c   :  { %1390 = shalt.err (!%p1387_p8)
}
  0x6d   :  { %s1391_s19 = scalar_lea.vmem %s106_s29, 16  ;;  %s1395_s7 = scalar_lea.vmem %s106_s29, 32 }
  0x6e   :  { %p1392_p9 = scmp.ne.s32.totalorder %s106_s29, %s1391_s19  ;;  %p1396_p10 = scmp.lt.s32.totalorder %s106_s29, %s106_s29 }
  0x6f   :  { %p1397_p11 = scmp.lt.s32.totalorder %s1395_s7, %s1391_s19 }
  0x71   :  { %p1398_p12 = por %p1397_p11, %p1396_p10 }
  0x73   :  { %p1399_p13 = pnand %p1398_p12, %p1392_p9 }
  0x75   :  { %1402 = shalt.err (!%p1399_p13)
}
  0x76   :  { %108 = dma.hbm_to_vmem [thread:$0]  %s1885_s9, 16, %s106_s29, [#allocation12]  }
  0x77   :  { %1425 = dma.done.wait [#allocation3], 256  }
  0x78   :  { %1426 = vsyncadd [#allocation3], 4294967040 }
  0x79   :  { %1427 = dma.done.wait [#allocation6], 768  }
  0x7a   :  { %1428 = vsyncadd [#allocation6], 4294966528 }
  0x7b   :  { %1429 = dma.done.wait [#allocation9], 528  }
  0x7c   :  { %1430 = vsyncadd [#allocation9], 4294966768 }
  0x7d   :  { %1431 = dma.done.wait [#allocation12], 528  }
  0x7e   :  { %1432 = vsyncadd [#allocation12], 4294966768  ;;  %vm157_vm0 = vcmask 261120   ;;  %v146_v0 = vld [vmem:[#allocation7] sm:$0xff]  ;;  %v147_v1 = vld [vmem:[#allocation7 + $0x8] sm:$0xff]  ;;  %v637_v21 = vlaneseq  ;;  %vm409_vm9 = vcmask 130048  }
  0x7f   :  { %v148_v2 = vld [vmem:[#allocation7 + $0x10] sm:$0xff]  ;;  %v1182_v3 = vpack.c.bf16 %v147_v1, %v146_v0  ;;  %v149_v4 = vld [vmem:[#allocation7 + $0x18] sm:$0xff]  ;;  %v1631_v5 = vld [vmem:[#allocation2] sm:$0xff]  ;;  %vm1011_vm10 = vcmask 1041409   ;;  %vm1013_vm11 = vcmask 1042434   ;;  %vm1015_vm12 = vcmask 1043459  }
  0x80   :  { %v1186_v6 = vpack.c.bf16 %v149_v4, %v148_v2  ;;  %1150 = vmatprep.mubr.msk.f32.mxu0 %vm157_vm0, %v1631_v5  ;;  %v241_v7 = vld [vmem:[#allocation8] sm:$0xff]  ;;  %v242_v8 = vld [vmem:[#allocation8 + $0x8] sm:$0xff]  ;;  %v243_v11 = vld [vmem:[#allocation8 + $0x10] sm:$0xff]  ;;  %v1644_v22 = vshrl.u32 %v637_v21, 7  ;;  %v946_v23 = vand.u32 127, %v637_v21  ;;  %vm1017_vm13 = vcmask 1044484  }
  0x81   :  { %1183 = vmatprep.subr.bf16.mxu0 %v1182_v3  ;;  %v1190_v9 = vpack.c.bf16 %v242_v8, %v241_v7  ;;  %v1635_v10 = vld [vmem:[#allocation2 + $0x8] sm:$0xff]  ;;  %v244_v12 = vld [vmem:[#allocation8 + $0x18] sm:$0xff]  ;;  %v1103_v14 = vld [vmem:[%s1879_s3] ss:$0 sm:$0xff]  ;;  %vm1019_vm14 = vcmask 1045509   ;;  %vm1021_vm15 = vcmask 1046534  }
  0x82   :  { %1185 = vmatpush3.bf16.msra.mxu0 %v1182_v3  ;;  %v1194_v13 = vpack.c.bf16 %v244_v12, %v243_v11  ;;  %v1647_v24 = vsub.s32 %v946_v23, %v1644_v22  ;;  %v1106_v25 = vld [vmem:[%s1881_s5] ss:$0 sm:$0xff]  ;;  %v433_v63 = vld [vmem:[%s1882_s6 + $0x8] sm:$0xff] }
  0x83   :  { %1187 = vmatprep.subr.bf16.mxu0 %v1186_v6  ;;  %1191 = vmatprep.subr.bf16.mxu1 %v1190_v9  ;;  %v432_v62 = vld [vmem:[%s1882_s6] sm:$0xff]  ;;  %s1444_s6 = smov 112  }
  0x84   :  { %1193 = vmatpush3.bf16.msra.mxu1 %v1190_v9  ;;  %v1198_v0 = vpack.c.bf16 %v433_v63, %v432_v62 }
  0x85   :  { %1195 = vmatprep.subr.bf16.mxu1 %v1194_v13 }
  0x86   :  { %1189 = vmatpush3.bf16.msra.mxu0 %v1186_v6 }
  0x87   :  { %1199 = vmatprep.subr.bf16.mxu0 %v1198_v0 }
  0x88   :  { %1197 = vmatpush3.bf16.msra.mxu1 %v1194_v13  ;;  %v1445_v13 = vmov 1966171168  }
  0x89   :  { %1151 = vmatmul.mubr.msk.f32.vlgmr.msra.gmra.mrb[0].mxu0 %vm157_vm0, %v1635_v10 }
  0x8a   :  { %1201 = vmatpush3.bf16.msra.mxu0 %v1198_v0 }
 0x15c   :  { %v1152_v15 = vpop.f32.mrb[0].mxu0 }
 0x15d   :  { %v236_v16 = vadd.f32 %v1152_v15, %v1103_v14  ;;  %v230_v17 = vpop.f32.mrb[1].mxu0 }
 0x15e   :  { %v231_v18 = vadd.f32 %v1103_v14, %v230_v17  ;;  %v635_v14 = vunpack.c.l.s4 %v1445_v13 }
 0x15f   :  { %v240_v20 = vmax.f32 %v236_v16, 0.0  ;;  %v1690_v16 = vld [vmem:[#allocation5] sm:$0xff] }
 0x160   :  { %v239_v19 = vmax.f32 %v231_v18, 0.0  ;;  %v636_v15 = vunpack.c.0.s8 %v635_v14 }
 0x162   :  { %1161 = vmatprep.mubr.msk.f32.mxu1 %vm157_vm0, %v239_v19  ;;  %v1693_v18 = vsub.s32 %v636_v15, %v1644_v22 }
 0x163   :  { %1162 = vmatmul.mubr.msk.f32.vlgmr.msra.gmra.mrb[0].mxu1 %vm157_vm0, %v240_v20  ;;  %v1696_v20 = vld [vmem:[#allocation5 + $0x8] sm:$0xff] }
 0x236   :  { %v1163_v26 = vpop.f32.mrb[0].mxu1 }
 0x237   :  { %v1652_v27 = vadd.f32 %v1163_v26, %v1106_v25  ;;  %v324_v28 = vpop.f32.mrb[1].mxu1 }
 0x238   :  { %v1654_v29 = vadd.f32 %v1106_v25, %v324_v28  ;;  %v1700_v25 = vsub.s32 0, %v1644_v22 }
 0x239   :  { %v340_v30 = vand.u32 2147483647, %v1652_v27  ;;  %v334_v50 = vmax.f32 %v1652_v27, 0.0  ;;  %vm336_vm3 = vcmp.ne.f32.partialorder %v1652_v27, %v1652_v27 }
 0x23a   :  { %v339_v31 = vand.u32 2147483647, %v1654_v29  ;;  %v333_v54 = vmax.f32 %v1654_v29, 0.0  ;;  %vm335_vm4 = vcmp.ne.f32.partialorder %v1654_v29, %v1654_v29 }
 0x23b   :  { %v342_v32 = vsub.f32 0.0, %v340_v30 }
 0x23c   :  { %v341_v33 = vsub.f32 0.0, %v339_v31 }
 0x23d   :  { %v345_v34 = vmul.f32 1.442695, %v342_v32  ;;  %v1710_v32 = vld [vmem:[%s1886_s10] sm:$0xff] }
 0x23e   :  { %v343_v35 = vmul.f32 1.442695, %v341_v33 }
 0x23f   :  { %1225 = vpow2.f32 %v345_v34 }
 0x240   :  { %1227 = vpow2.f32 %v343_v35 }
 0x249   :  { %v1226_v36 = vpop.eup %1225 }
 0x24a   :  { %v1228_v37 = vpop.eup %1227  ;;  %v356_v38 = vadd.f32 1.0, %v1226_v36  ;;  %v359_v40 = vmul.f32 -0.5, %v1226_v36  ;;  %v362_v43 = vand.u32 2147483647, %v1226_v36 }
 0x24b   :  { %v347_v39 = vadd.f32 1.0, %v1228_v37  ;;  %v350_v41 = vmul.f32 -0.5, %v1228_v37  ;;  %v353_v45 = vand.u32 2147483647, %v1228_v37 }
 0x24c   :  { %1229 = vlog2.f32 %v356_v38  ;;  %v360_v42 = vadd.f32 1.0, %v359_v40  ;;  %vm363_vm1 = vcmp.lt.f32.partialorder %v362_v43, 0.0004427343 }
 0x24d   :  { %1231 = vlog2.f32 %v347_v39  ;;  %v351_v44 = vadd.f32 1.0, %v350_v41  ;;  %vm354_vm2 = vcmp.lt.f32.partialorder %v353_v45, 0.0004427343  ;;  %v1721_v39 = vld [vmem:[%s1887_s11] sm:$0xff] }
 0x24e   :  { %v361_v49 = vmul.f32 %v1226_v36, %v360_v42 }
 0x24f   :  { %v352_v52 = vmul.f32 %v1228_v37, %v351_v44 }
 0x256   :  { %v1230_v46 = vpop.eup %1229 }
 0x257   :  { %v1232_v47 = vpop.eup %1231  ;;  %v358_v48 = vmul.f32 0.6931472, %v1230_v46 }
 0x258   :  { %v349_v51 = vmul.f32 0.6931472, %v1232_v47 }
 0x259   :  { %v364_v53 = vsel %vm363_vm1, %v361_v49, %v358_v48  ;;  %vm1023_vm1 = vcmask 1047559  }
 0x25a   :  { %v366_v55 = vadd.f32 %v364_v53, %v334_v50  ;;  %v355_v56 = vsel %vm354_vm2, %v352_v52, %v349_v51  ;;  %vm1036_vm2 = vcmask 64512  }
 0x25b   :  { %v365_v57 = vadd.f32 %v355_v56, %v333_v54 }
 0x25c   :  { %v368_v58 = vsel %vm336_vm3, %v1652_v27, %v366_v55  ;;  %vm140_vm3 = vcmask 0  }
 0x25d   :  { %v1665_v59 = vadd.f32 1e-08, %v368_v58  ;;  %v367_v60 = vsel %vm335_vm4, %v1654_v29, %v365_v57 }
 0x25e   :  { %v1668_v61 = vadd.f32 1e-08, %v367_v60 }
 0x25f   :  { %1233 = vrsqrt.f32 %v1665_v59  ;;  %vm380_vm7 = vcmp.eq.f32.partialorder %v1665_v59, inf  ;;  %v383_v11 = vand.u32 2147483648, %v1665_v59  ;;  %vm382_vm8 = vcmp.eq.f32.partialorder %v1665_v59, 0.0 }
 0x260   :  { %1235 = vrsqrt.f32 %v1668_v61  ;;  %vm373_vm5 = vcmp.eq.f32.partialorder %v1668_v61, inf  ;;  %v376_v6 = vand.u32 2147483648, %v1668_v61  ;;  %vm375_vm6 = vcmp.eq.f32.partialorder %v1668_v61, 0.0 }
 0x261   :  { %1237 = vlog2.f32 %v1665_v59 }
 0x262   :  { %1239 = vlog2.f32 %v1668_v61 }
 0x269   :  { %v1234_v1 = vpop.eup %1233 }
 0x26a   :  { %v1236_v2 = vpop.eup %1235  ;;  %v379_v4 = vmul.f32 %v1234_v1, %v1665_v59 }
 0x26b   :  { %v372_v3 = vmul.f32 %v1236_v2, %v1668_v61 }
 0x26c   :  { %v381_v9 = vsel %vm380_vm7, %v1665_v59, %v379_v4 }
 0x26d   :  { %v374_v7 = vsel %vm373_vm5, %v1668_v61, %v372_v3  ;;  %v384_v12 = vsel %vm382_vm8, %v383_v11, %v381_v9 }
 0x26e   :  { %v377_v8 = vsel %vm375_vm6, %v376_v6, %v374_v7 }
 0x26f   :  { %387 = vrot.lane.b32.xlu0 %v377_v8, %s1444_s6 }
 0x273   :  { %389 = vrot.lane.b32.xlu0 %v384_v12, %s1444_s6 }
 0x2e1   :  { %v388_v17 = vpop.permute.xlu0 %387 }
 0x2e2   :  { %v393_v19 = vmul.f32 %v388_v17, %v1690_v16 }
 0x2e4   :  { %v395_v21 = vadd.f32 %v393_v19, %v1654_v29 }
 0x2e5   :  { %v390_v23 = vpop.permute.xlu0 %389 }
 0x2e6   :  { %v640_v26 = vrot.slane %v395_v21, %v1693_v18  ;;  %v394_v28 = vmul.f32 %v390_v23, %v1696_v20  ;;  %1168 = vmatprep.mubr.msk.f32.mxu0 %vm409_vm9, %v395_v21  ;;  %v633_v34 = vcombine.high %v395_v21, %v395_v21 }
 0x2e8   :  { %v396_v30 = vadd.f32 %v394_v28, %v1652_v27  ;;  %v656_v31 = vrot.slane %v640_v26, %v1693_v18  ;;  %v648_v35 = vcombine.high %v640_v26, %v640_v26  ;;  %v1728_v44 = vrot.slane %v633_v34, %v1693_v18 }
 0x2ea   :  { %v682_v29 = vcombine.high %v396_v30, %v396_v30  ;;  %v689_v33 = vrot.slane %v396_v30, %v1693_v18  ;;  %1169 = vmatmul.mubr.msk.f32.vlgmr.msra.gmra.mrb[2].mxu0 %vm409_vm9, %v396_v30  ;;  %v734_v22 = vrot.slane %v656_v31, %v1700_v25  ;;  %v1732_v47 = vrot.slane %v648_v35, %v1693_v18 }
 0x2eb   :  { %v678_v55 = vcombine.high %v656_v31, %v656_v31  ;;  %v663_v14 = vrot.slane %v1728_v44, %v1693_v18 }
 0x2ec   :  { %v696_v36 = vrot.slane %v682_v29, %v1693_v18  ;;  %v697_v37 = vcombine.high %v689_v33, %v689_v33  ;;  %v811_v27 = vsub.f32 %v734_v22, %v1710_v32  ;;  %v705_v38 = vrot.slane %v689_v33, %v1693_v18 }
 0x2ed   :  { %v738_v1 = vrot.slane %v1732_v47, %v1700_v25  ;;  %v742_v21 = vrot.slane %v678_v55, %v1700_v25  ;;  %v750_v34 = vrot.slane %v663_v14, %v1700_v25 }
 0x2ee   :  { %v827_v40 = vmul.f32 %v811_v27, %v811_v27  ;;  %v766_v41 = vrot.slane %v705_v38, %v1700_v25  ;;  %v1725_v42 = vrot.slane %v697_v37, %v1693_v18  ;;  %v698_v43 = vcombine.high %v696_v36, %v696_v36 }
 0x2ef   :  { %v727_v45 = vcombine.high %v705_v38, %v705_v38  ;;  %v712_v46 = vrot.slane %v696_v36, %v1693_v18  ;;  %v812_v19 = vsub.f32 %v738_v1, %v1710_v32  ;;  %v813_v22 = vsub.f32 %v742_v21, %v1710_v32 }
 0x2f0   :  { %v843_v48 = vmul.f32 %v827_v40, %v1721_v39  ;;  %v819_v49 = vsub.f32 %v766_v41, %v1710_v32  ;;  %v770_v50 = vrot.slane %v1725_v42, %v1700_v25  ;;  %v726_v51 = vrot.slane %v698_v43, %v1693_v18 }
 0x2f1   :  { %v774_v52 = vrot.slane %v727_v45, %v1700_v25  ;;  %v728_v53 = vcombine.high %v712_v46, %v712_v46  ;;  %v782_v54 = vrot.slane %v712_v46, %v1700_v25  ;;  %v828_v37 = vmul.f32 %v812_v19, %v812_v19 }
 0x2f2   :  { %v859_v56 = vsel %vm409_vm9, %v843_v48, 0.0  ;;  %v835_v57 = vmul.f32 %v819_v49, %v819_v49  ;;  %v820_v58 = vsub.f32 %v770_v50, %v1710_v32  ;;  %v786_v60 = vrot.slane %v726_v51, %v1700_v25 }
 0x2f3   :  { %860 = vadd.xlane.f32.xlu1 %v859_v56  ;;  %v821_v62 = vsub.f32 %v774_v52, %v1710_v32  ;;  %v790_v63 = vrot.slane %v728_v53, %v1700_v25  ;;  %v730_v0 = vcombine.high %v726_v51, %v726_v51  ;;  %v823_v6 = vsub.f32 %v782_v54, %v1710_v32 }
 0x2f4   :  { %v851_v2 = vmul.f32 %v835_v57, %v1721_v39  ;;  %v836_v3 = vmul.f32 %v820_v58, %v820_v58  ;;  %v824_v4 = vsub.f32 %v786_v60, %v1710_v32  ;;  %v729_v27 = vcombine.high %v1725_v42, %v1725_v42 }
 0x2f5   :  { %v837_v7 = vmul.f32 %v821_v62, %v821_v62  ;;  %v825_v8 = vsub.f32 %v790_v63, %v1710_v32  ;;  %v794_v9 = vrot.slane %v730_v0, %v1700_v25  ;;  %v839_v30 = vmul.f32 %v823_v6, %v823_v6 }
 0x2f6   :  { %v883_v11 = vsel %vm409_vm9, %v851_v2, 0.0  ;;  %v852_v12 = vmul.f32 %v836_v3, %v1721_v39  ;;  %v840_v13 = vmul.f32 %v824_v4, %v824_v4  ;;  %v829_v41 = vmul.f32 %v813_v22, %v813_v22 }
 0x2f7   :  { %884 = vadd.xlane.f32.xlu0 %v883_v11  ;;  %v841_v15 = vmul.f32 %v825_v8, %v825_v8  ;;  %v826_v17 = vsub.f32 %v794_v9, %v1710_v32  ;;  %v853_v28 = vmul.f32 %v837_v7, %v1721_v39  ;;  %v855_v36 = vmul.f32 %v839_v30, %v1721_v39 }
 0x2f8   :  { %v886_v23 = vsel %vm409_vm9, %v852_v12, 0.0  ;;  %v856_v26 = vmul.f32 %v840_v13, %v1721_v39  ;;  %v815_v43 = vsub.f32 %v750_v34, %v1710_v32  ;;  %v649_v45 = vcombine.high %v1728_v44, %v1728_v44 }
 0x2f9   :  { %887 = vadd.xlane.f32.xlu1 %v886_v23  ;;  %v857_v29 = vmul.f32 %v841_v15, %v1721_v39  ;;  %v842_v33 = vmul.f32 %v826_v17, %v826_v17  ;;  %v889_v35 = vsel %vm409_vm9, %v853_v28, 0.0  ;;  %v895_v46 = vsel %vm409_vm9, %v855_v36, 0.0  ;;  %v525_v28 = vld [vmem:[#allocation11 + $0x8] sm:$0xff] }
 0x2fa   :  { %v898_v31 = vsel %vm409_vm9, %v856_v26, 0.0  ;;  %v844_v48 = vmul.f32 %v828_v37, %v1721_v39  ;;  %v778_v49 = vrot.slane %v729_v27, %v1700_v25  ;;  %v680_v42 = vcombine.high %v1732_v47, %v1732_v47  ;;  %v524_v26 = vld [vmem:[#allocation11] sm:$0xff] }
 0x2fb   :  { %899 = vadd.xlane.f32.xlu0 %v898_v31  ;;  %v901_v38 = vsel %vm409_vm9, %v857_v29, 0.0  ;;  %v858_v40 = vmul.f32 %v842_v33, %v1721_v39  ;;  %v845_v51 = vmul.f32 %v829_v41, %v1721_v39  ;;  %v831_v52 = vmul.f32 %v815_v43, %v815_v43  ;;  %v527_v31 = vld [vmem:[#allocation11 + $0x18] sm:$0xff] }
 0x2fc   :  { %v862_v53 = vsel %vm409_vm9, %v844_v48, 0.0  ;;  %v822_v44 = vsub.f32 %v778_v49, %v1710_v32  ;;  %v746_v54 = vrot.slane %v680_v42, %v1700_v25  ;;  %v677_v55 = vrot.slane %v649_v45, %v1693_v18 }
 0x2fd   :  { %890 = vadd.xlane.f32.xlu1 %v889_v35  ;;  %v904_v50 = vsel %vm409_vm9, %v858_v40, 0.0  ;;  %v865_v56 = vsel %vm409_vm9, %v845_v51, 0.0  ;;  %v847_v47 = vmul.f32 %v831_v52, %v1721_v39  ;;  %v679_v62 = vcombine.high %v663_v14, %v663_v14 }
 0x2fe   :  { %v838_v57 = vmul.f32 %v822_v44, %v822_v44  ;;  %v814_v58 = vsub.f32 %v746_v54, %v1710_v32  ;;  %v754_v60 = vrot.slane %v677_v55, %v1700_v25  ;;  %v681_v0 = vcombine.high %v677_v55, %v677_v55 }
 0x2ff   :  { %902 = vadd.xlane.f32.xlu0 %v901_v38  ;;  %v871_v63 = vsel %vm409_vm9, %v847_v47, 0.0  ;;  %v758_v3 = vrot.slane %v679_v62, %v1700_v25  ;;  %v1202_v30 = vpack.c.bf16 %v525_v28, %v524_v26 }
 0x300   :  { %v854_v1 = vmul.f32 %v838_v57, %v1721_v39  ;;  %v830_v2 = vmul.f32 %v814_v58, %v814_v58  ;;  %v816_v18 = vsub.f32 %v754_v60, %v1710_v32  ;;  %v762_v4 = vrot.slane %v681_v0, %v1700_v25 }
 0x301   :  { %896 = vadd.xlane.f32.xlu1 %v895_v46  ;;  %v817_v9 = vsub.f32 %v758_v3, %v1710_v32  ;;  %1203 = vmatprep.subr.bf16.mxu1 %v1202_v30 }
 0x302   :  { %v892_v6 = vsel %vm409_vm9, %v854_v1, 0.0  ;;  %v846_v7 = vmul.f32 %v830_v2, %v1721_v39  ;;  %v832_v8 = vmul.f32 %v816_v18, %v816_v18  ;;  %v818_v14 = vsub.f32 %v762_v4, %v1710_v32  ;;  %1205 = vmatpush3.bf16.msra.mxu1 %v1202_v30  ;;  %v526_v32 = vld [vmem:[#allocation11 + $0x10] sm:$0xff] }
 0x303   :  { %905 = vadd.xlane.f32.xlu0 %v904_v50  ;;  %v833_v13 = vmul.f32 %v817_v9, %v817_v9  ;;  %v1206_v29 = vpack.c.bf16 %v527_v31, %v526_v32 }
 0x304   :  { %v868_v11 = vsel %vm409_vm9, %v846_v7, 0.0  ;;  %v848_v12 = vmul.f32 %v832_v8, %v1721_v39  ;;  %v834_v17 = vmul.f32 %v818_v14, %v818_v14 }
 0x305   :  { %863 = vadd.xlane.f32.xlu1 %v862_v53  ;;  %v849_v25 = vmul.f32 %v833_v13, %v1721_v39  ;;  %1207 = vmatprep.subr.bf16.mxu1 %v1206_v29 }
 0x306   :  { %v874_v15 = vsel %vm409_vm9, %v848_v12, 0.0  ;;  %v850_v21 = vmul.f32 %v834_v17, %v1721_v39  ;;  %1209 = vmatpush3.bf16.msra.mxu1 %v1206_v29 }
 0x307   :  { %v877_v19 = vsel %vm409_vm9, %v849_v25, 0.0 }
 0x308   :  { %v880_v23 = vsel %vm409_vm9, %v850_v21, 0.0 }
 0x309   :  { %866 = vadd.xlane.f32.xlu1 %v865_v56 }
 0x30d   :  { %872 = vadd.xlane.f32.xlu1 %v871_v63 }
 0x311   :  { %893 = vadd.xlane.f32.xlu1 %v892_v6  ;;  %v1119_v6 = vld [vmem:[%s1888_s12] ss:$0 sm:$0xff]  ;;  %s1447_s12 = smov [#allocation14]  }
 0x312   :  { %s1091_s20 = sshll.u32 %s1447_s12, 4  ;;  %s1092_s20 = int_to_ptr.vmem [resolvable:$true] %s1091_s20 }
 0x313   :  { %s1403_s29 = scalar_lea.vmem %s1092_s20, 16  ;;  %s1407_s15 = scalar_lea.vmem %s1092_s20, 32 }
 0x314   :  { %p1404_p0 = scmp.ne.s32.totalorder %s1092_s20, %s1403_s29  ;;  %p1408_p1 = scmp.lt.s32.totalorder %s1092_s20, %s1092_s20 }
 0x315   :  { %869 = vadd.xlane.f32.xlu1 %v868_v11  ;;  %p1409_p2 = scmp.lt.s32.totalorder %s1407_s15, %s1403_s29 }
 0x317   :  { %p1410_p3 = por %p1409_p2, %p1408_p1 }
 0x319   :  { %875 = vadd.xlane.f32.xlu1 %v874_v15  ;;  %p1411_p4 = pnand %p1410_p3, %p1404_p0 }
 0x31d   :  { %878 = vadd.xlane.f32.xlu1 %v877_v19 }
 0x321   :  { %881 = vadd.xlane.f32.xlu1 %v880_v23 }
 0x380   :  { %v861_v33 = vpop.xlane.xlu1 %860 }
 0x381   :  { %v907_v18 = vmul.f32 -0.5, %v861_v33 }
 0x383   :  { %v950_v15 = vrot.slane %v907_v18, %v1647_v24 }
 0x384   :  { %v885_v35 = vpop.xlane.xlu0 %884 }
 0x385   :  { %v915_v45 = vmul.f32 -0.5, %v885_v35 }
 0x386   :  { %v888_v22 = vpop.xlane.xlu1 %887 }
 0x387   :  { %v916_v40 = vmul.f32 -0.5, %v888_v22  ;;  %v982_v51 = vrot.slane %v915_v45, %v1647_v24 }
 0x388   :  { %v900_v39 = vpop.xlane.xlu0 %899 }
 0x389   :  { %v986_v46 = vrot.slane %v916_v40, %v1647_v24  ;;  %v920_v52 = vmul.f32 -0.5, %v900_v39 }
 0x38a   :  { %v891_v34 = vpop.xlane.xlu1 %890 }
 0x38b   :  { %v917_v41 = vmul.f32 -0.5, %v891_v34  ;;  %v1025_v54 = vsel %vm1011_vm10, %v986_v46, %v982_v51  ;;  %v1002_v60 = vrot.slane %v920_v52, %v1647_v24 }
 0x38c   :  { %v903_v38 = vpop.xlane.xlu0 %902 }
 0x38d   :  { %v990_v48 = vrot.slane %v917_v41, %v1647_v24  ;;  %v921_v44 = vmul.f32 -0.5, %v903_v38  ;;  %v1111_v41 = vld [vmem:[#allocation10] ss:$0 sm:$0xff] }
 0x38e   :  { %v897_v36 = vpop.xlane.xlu1 %896 }
 0x38f   :  { %v919_v49 = vmul.f32 -0.5, %v897_v36  ;;  %v1026_v47 = vsel %vm1013_vm11, %v990_v48, %v1025_v54  ;;  %v1006_v0 = vrot.slane %v921_v44, %v1647_v24 }
 0x390   :  { %v906_v42 = vpop.xlane.xlu0 %905 }
 0x391   :  { %v922_v55 = vmul.f32 -0.5, %v906_v42  ;;  %v998_v57 = vrot.slane %v919_v49, %v1647_v24 }
 0x392   :  { %v864_v37 = vpop.xlane.xlu1 %863 }
 0x393   :  { %v908_v62 = vmul.f32 -0.5, %v864_v37  ;;  %v1010_v3 = vrot.slane %v922_v55, %v1647_v24 }
 0x395   :  { %v954_v11 = vrot.slane %v908_v62, %v1647_v24 }
 0x396   :  { %v867_v27 = vpop.xlane.xlu1 %866 }
 0x397   :  { %v909_v1 = vmul.f32 -0.5, %v867_v27  ;;  %v1012_v26 = vsel %vm1011_vm10, %v954_v11, %v950_v15 }
 0x399   :  { %v958_v13 = vrot.slane %v909_v1, %v1647_v24 }
 0x39a   :  { %v873_v43 = vpop.xlane.xlu1 %872 }
 0x39b   :  { %v911_v19 = vmul.f32 -0.5, %v873_v43  ;;  %v1014_v30 = vsel %vm1013_vm11, %v958_v13, %v1012_v26  ;;  %v1238_v43 = vpop.eup %1237 }
 0x39c   :  { %v400_v42 = vmul.f32 0.6931472, %v1238_v43  ;;  %v1240_v59 = vpop.eup %1239 }
 0x39d   :  { %v966_v29 = vrot.slane %v911_v19, %v1647_v24  ;;  %v398_v51 = vmul.f32 0.6931472, %v1240_v59 }
 0x39e   :  { %v894_v50 = vpop.xlane.xlu1 %893 }
 0x39f   :  { %v918_v53 = vmul.f32 -0.5, %v894_v50 }
 0x3a1   :  { %v994_v56 = vrot.slane %v918_v53, %v1647_v24 }
 0x3a2   :  { %v870_v58 = vpop.xlane.xlu1 %869 }
 0x3a3   :  { %v1027_v63 = vsel %vm1015_vm12, %v994_v56, %v1026_v47  ;;  %v910_v4 = vmul.f32 -0.5, %v870_v58  ;;  %v421_v58 = vmul.f32 %v1696_v20, %v1696_v20  ;;  %v1114_v20 = vld [vmem:[#allocation13] ss:$0 sm:$0xff] }
 0x3a4   :  { %v1028_v2 = vsel %vm1017_vm13, %v998_v57, %v1027_v63 }
 0x3a5   :  { %v1029_v7 = vsel %vm1019_vm14, %v1002_v60, %v1028_v2  ;;  %v962_v25 = vrot.slane %v910_v4, %v1647_v24  ;;  %v425_v62 = vsel %vm409_vm9, %v421_v58, 0.0  ;;  %v420_v2 = vmul.f32 %v1690_v16, %v1690_v16 }
 0x3a6   :  { %v876_v8 = vpop.xlane.xlu1 %875  ;;  %v1030_v9 = vsel %vm1021_vm15, %v1006_v0, %v1029_v7 }
 0x3a7   :  { %v1031_v12 = vsel %vm1023_vm1, %v1010_v3, %v1030_v9  ;;  %v912_v17 = vmul.f32 -0.5, %v876_v8  ;;  %v1016_v32 = vsel %vm1015_vm12, %v962_v25, %v1014_v30  ;;  %v422_v3 = vsel %vm409_vm9, %v420_v2, 0.0 }
 0x3a8   :  { %v1035_v14 = vadd.f32 %v1119_v6, %v1031_v12  ;;  %v1018_v35 = vsel %vm1017_vm13, %v966_v29, %v1016_v32 }
 0x3a9   :  { %v970_v31 = vrot.slane %v912_v17, %v1647_v24 }
 0x3aa   :  { %v879_v21 = vpop.xlane.xlu1 %878  ;;  %v1040_v23 = vsel %vm1036_vm2, %v1035_v14, -inf }
 0x3ab   :  { %v913_v28 = vmul.f32 -0.5, %v879_v21  ;;  %1041 = vmax.xlane.f32.xlu0 %v1040_v23  ;;  %v1020_v36 = vsel %vm1019_vm14, %v970_v31, %v1018_v35 }
 0x3ad   :  { %v974_v33 = vrot.slane %v913_v28, %v1647_v24 }
 0x3ae   :  { %v882_v22 = vpop.xlane.xlu1 %881 }
 0x3af   :  { %v914_v34 = vmul.f32 -0.5, %v882_v22  ;;  %v1022_v37 = vsel %vm1021_vm15, %v974_v33, %v1020_v36 }
 0x3b1   :  { %v978_v39 = vrot.slane %v914_v34, %v1647_v24 }
 0x3b3   :  { %v1024_v27 = vsel %vm1023_vm1, %v978_v39, %v1022_v37 }
 0x3b4   :  { %v1034_v38 = vadd.f32 %v1119_v6, %v1024_v27 }
 0x3b6   :  { %v1037_v40 = vsel %vm1036_vm2, %v1034_v38, -inf }
 0x3b7   :  { %1038 = vmax.xlane.f32.xlu1 %v1037_v40 }
 0x3bd   :  { %v1170_v45 = vpop.f32.mrb[2].mxu0 }
 0x3be   :  { %v519_v46 = vadd.f32 %v1170_v45, %v1111_v41  ;;  %v513_v48 = vpop.f32.mrb[3].mxu0 }
 0x3bf   :  { %v514_v49 = vadd.f32 %v1111_v41, %v513_v48 }
 0x3c0   :  { %v523_v50 = vmax.f32 %v519_v46, 0.0 }
 0x3c1   :  { %v522_v24 = vmax.f32 %v514_v49, 0.0  ;;  %405 = vrot.lane.b32.xlu0 %v400_v42, %s1444_s6 }
 0x3c3   :  { %1179 = vmatprep.mubr.msk.f32.mxu1 %vm157_vm0, %v522_v24 }
 0x3c4   :  { %1180 = vmatmul.mubr.msk.f32.vlgmr.msra.gmra.mrb[2].mxu1 %vm157_vm0, %v523_v50 }
 0x3c8   :  { %403 = vrot.lane.b32.xlu1 %v398_v51, %s1444_s6 }
 0x438   :  { %v1042_v61 = vpop.xlane.xlu0 %1041 }
 0x439   :  { %v1044_v52 = vsub.f32 %v1035_v14, %v1042_v61 }
 0x43b   :  { %v1047_v53 = vmul.f32 1.442695, %v1044_v52 }
 0x43c   :  { %v406_v57 = vpop.permute.xlu0 %405 }
 0x43d   :  { %1241 = vpow2.f32 %v1047_v53  ;;  %v413_v60 = vsel %vm409_vm9, %v406_v57, 0.0 }
 0x444   :  { %v1039_v44 = vpop.xlane.xlu1 %1038 }
 0x445   :  { %v1043_v54 = vsub.f32 %v1034_v38, %v1039_v44 }
 0x447   :  { %v1242_v55 = vpop.eup %1241  ;;  %v1045_v56 = vmul.f32 1.442695, %v1043_v54 }
 0x448   :  { %v1052_v47 = vsel %vm1036_vm2, %v1242_v55, 0.0  ;;  %v404_v1 = vpop.permute.xlu1 %403 }
 0x449   :  { %1243 = vpow2.f32 %v1045_v56  ;;  %1053 = vadd.xlane.f32.xlu0 %v1052_v47  ;;  %v410_v18 = vsel %vm409_vm9, %v404_v1, 0.0 }
 0x44d   :  { %414 = vadd.xlane.f32.xlu0 %v413_v60 }
 0x451   :  { %426 = vadd.xlane.f32.xlu0 %v425_v62 }
 0x453   :  { %v1244_v63 = vpop.eup %1243 }
 0x454   :  { %v1049_v0 = vsel %vm1036_vm2, %v1244_v63, 0.0 }
 0x455   :  { %1050 = vadd.xlane.f32.xlu1 %v1049_v0 }
 0x459   :  { %411 = vadd.xlane.f32.xlu1 %v410_v18 }
 0x45d   :  { %423 = vadd.xlane.f32.xlu1 %v422_v3 }
 0x497   :  { %v1181_v4 = vpop.f32.mrb[2].mxu1 }
 0x498   :  { %v613_v6 = vadd.f32 %v1181_v4, %v1114_v20  ;;  %v607_v7 = vpop.f32.mrb[3].mxu1 }
 0x499   :  { %v608_v8 = vadd.f32 %v1114_v20, %v607_v7 }
 0x49a   :  { %v617_v9 = vsub.f32 %v1635_v10, %v613_v6 }
 0x49b   :  { %v616_v11 = vsub.f32 %v1631_v5, %v608_v8 }
 0x49c   :  { %v619_v12 = vmul.f32 %v617_v9, %v617_v9 }
 0x49d   :  { %v618_v13 = vmul.f32 %v616_v11, %v616_v11 }
 0x49e   :  { %v623_v14 = vsel %vm157_vm0, %v619_v12, 0.0 }
 0x49f   :  { %624 = vadd.xlane.f32.xlu0 %v623_v14  ;;  %v620_v16 = vsel %vm157_vm0, %v618_v13, 0.0  ;;  %vm1068_vm0 = vcmask 7168  }
 0x4a0   :  { %621 = vadd.xlane.f32.xlu1 %v620_v16 }
 0x4d6   :  { %v1054_v15 = vpop.xlane.xlu0 %1053 }
 0x4d7   :  { %1245 = vlog2.f32 %v1054_v15 }
 0x4da   :  { %v415_v17 = vpop.xlane.xlu0 %414 }
 0x4db   :  { %v417_v28 = vmul.f32 -0.5, %v415_v17 }
 0x4dd   :  { %v1110_v34 = vadd.f32 -14.703016, %v417_v28 }
 0x4de   :  { %v427_v26 = vpop.xlane.xlu0 %426 }
 0x4df   :  { %v429_v31 = vmul.f32 0.5, %v427_v26 }
 0x4e1   :  { %v1246_v21 = vpop.eup %1245  ;;  %v431_v38 = vsub.f32 %v1110_v34, %v429_v31 }
 0x4e2   :  { %v1051_v25 = vpop.xlane.xlu1 %1050  ;;  %v1058_v10 = vmul.f32 0.6931472, %v1246_v21 }
 0x4e3   :  { %1247 = vlog2.f32 %v1051_v25 }
 0x4e4   :  { %v1060_v22 = vadd.f32 %v1058_v10, %v1042_v61  ;;  %v1446_v61 = vmov 0.0  }
 0x4e5   :  { %141 = vst.msk [vmem:[#allocation14] sm:$0x1] %vm140_vm3, %v1446_v61 }
 0x4e6   :  { %v412_v19 = vpop.xlane.xlu1 %411  ;;  %v1065_v45 = vsub.f32 %v431_v38, %v1060_v22 }
 0x4e7   :  { %v416_v32 = vmul.f32 -0.5, %v412_v19 }
 0x4e9   :  { %v1109_v37 = vadd.f32 -14.703016, %v416_v32 }
 0x4ea   :  { %v424_v5 = vpop.xlane.xlu1 %423 }
 0x4eb   :  { %v428_v29 = vmul.f32 0.5, %v424_v5 }
 0x4ec   :  { %v1061_v57 = vld [vmem:[#allocation14] sm:$0x1] }
 0x4ed   :  { %v1248_v23 = vpop.eup %1247  ;;  %v430_v41 = vsub.f32 %v1109_v37, %v428_v29 }
 0x4ee   :  { %v1056_v30 = vmul.f32 0.6931472, %v1248_v23 }
 0x4f0   :  { %v1059_v39 = vadd.f32 %v1056_v30, %v1039_v44 }
 0x4f2   :  { %v1064_v48 = vsub.f32 %v430_v41, %v1059_v39 }
 0x52c   :  { %v625_v33 = vpop.xlane.xlu0 %624 }
 0x52d   :  { %v627_v35 = vmul.f32 -0.5, %v625_v33  ;;  %v622_v36 = vpop.xlane.xlu1 %621 }
 0x52e   :  { %v626_v27 = vmul.f32 -0.5, %v622_v36 }
 0x52f   :  { %v1118_v40 = vadd.f32 -29.406033, %v627_v35 }
 0x530   :  { %v1117_v43 = vadd.f32 -29.406033, %v626_v27 }
 0x531   :  { %v1063_v46 = vsub.f32 0.0, %v1118_v40 }
 0x532   :  { %v1062_v49 = vsub.f32 0.0, %v1117_v43 }
 0x533   :  { %v1067_v42 = vadd.f32 %v1065_v45, %v1063_v46 }
 0x534   :  { %v1066_v24 = vadd.f32 %v1064_v48, %v1062_v49 }
 0x535   :  { %v1070_v50 = vsel %vm1068_vm0, %v1067_v42, 0.0 }
 0x536   :  { %v1069_v59 = vsel %vm1068_vm0, %v1066_v24, 0.0 }
 0x537   :  { %v1071_v51 = vadd.f32 %v1070_v50, %v1069_v59 }
 0x539   :  { %1072 = vadd.xlane.f32.xlu1 %v1071_v51 }
 0x5c6   :  { %v1073_v52 = vpop.xlane.xlu1 %1072 }
 0x5c7   :  { %v1074_v53 = vrot.slane %v1073_v52, 4 }
 0x5c9   :  { %v1075_v44 = vadd.f32 %v1074_v53, %v1073_v52 }
 0x5cb   :  { %v1076_v54 = vrot.slane %v1075_v44, 2 }
 0x5cd   :  { %v1077_v55 = vadd.f32 %v1076_v54, %v1075_v44 }
 0x5cf   :  { %v1078_v56 = vrot.slane %v1077_v55, 1 }
 0x5d1   :  { %v1079_v47 = vadd.f32 %v1078_v56, %v1077_v55 }
 0x5d3   :  { %1210 = vpush %v1079_v47 }
 0x604   :  { %s1211_s21 = spop %1210 }
 0x605   :  { %v1081_v58 = vstv %s1211_s21 }
 0x606   :  { %v1082_v60 = vadd.f32 %v1081_v58, %v1061_v57 }
 0x608   :  { %1084 = vst.msk [vmem:[#allocation14] sm:$0x1] %vm140_vm3, %v1082_v60 }
 0x609   :  { %1414 = shalt.err (!%p1411_p4)
}
 0x60a   :  { %s1415_s26 = scalar_lea.hbm %s1889_s13, 16 }
 0x60b   :  { %p1416_p5 = scmp.ne.s32.totalorder %s1889_s13, %s1415_s26  ;;  %p1419_p6 = scmp.lt.u32.totalorder %s1415_s26, %s1889_s13 }
 0x60d   :  { %p1421_p7 = pnand %p1419_p6, %p1416_p5 }
 0x60f   :  { %1424 = shalt.err (!%p1421_p7)
}
 0x610   :  { %1094 = dma.vmem_to_hbm [thread:$0]  %s1092_s20, 16, %s1889_s13, [#allocation4]  }
 0x611   :  { %1433 = dma.done.wait [#allocation4], 16  }
 0x612   :  { %1434 = vsyncadd [#allocation4], 4294967280 }
 0x613   :  { %1098 = vsyncpa [#allocation3], 1 }
 0x614   :  { %1099 = vsyncpa [#allocation6], 1 }
 0x615   :  { %1100 = vsyncpa [#allocation9], 1 }
 0x616   :  { %1101 = vsyncpa [#allocation12], 1 }
 0x617   :  { %1102 = vsyncpa [#allocation4], 1 }

</bundles_post_ra>
